<compile_context>
chip_gen: v5e
topology: v5e:2x2
jax: 0.10.0
libtpu: 0.0.40
codegen_flags: <defaults>
</compile_context>

<pallas_src>
import functools
import math

import jax
import jax.numpy as jnp
from jax import lax
from jax.experimental import pallas as pl
from jax.experimental.pallas import tpu as pltpu


def _round_up(x, mult):
    return ((x + mult - 1) // mult) * mult


# --------------------------------------------------------------------------
# Kernel 1 (init only): nearest neighbour.
#   stations on sublanes, grid points on lanes; running min/argmin over the
#   grid-point axis kept in VMEM scratch; sqrt applied only to the final
#   (tm, 1) minima.  Padded-column masking only on the last reduction tile.
# --------------------------------------------------------------------------
def _nearest_kernel(a_ref, b_ref, idx_ref, dist_ref, min_sq, arg_min, *,
                    n_true, tn):
    k = pl.program_id(1)
    nk = pl.num_programs(1)

    @pl.when(k == 0)
    def _():
        min_sq[...] = jnp.full_like(min_sq, jnp.inf)
        arg_min[...] = jnp.zeros_like(arg_min)

    ax = a_ref[:, 0:1]                       # (tm, 1) station x
    ay = a_ref[:, 1:2]                       # (tm, 1) station y
    bx = b_ref[0:1, :]                       # (1, tn) grid x (lane-dense)
    by = b_ref[1:2, :]                       # (1, tn) grid y

    dx = bx - ax
    dy = by - ay
    d2 = dx * dx + dy * dy                   # (tm, tn) squared distances (VPU)

    # global grid-point index of each lane in this tile
    col = lax.broadcasted_iota(jnp.int32, d2.shape, 1) + k * tn

    def update(d2v):
        # TODO(synk): min/argmin still take two reduction passes; a fused
        # running (value, index) pass would shave ~30% init VALU/XLU work.
        tile_min = jnp.min(d2v, axis=1, keepdims=True)               # (tm, 1)
        big = jnp.int32(2 ** 31 - 1)
        tile_arg = jnp.min(jnp.where(d2v == tile_min, col, big),
                           axis=1, keepdims=True)                    # (tm, 1)
        better = tile_min < min_sq[...]      # strict < keeps first occurrence
        arg_min[...] = jnp.where(better, tile_arg, arg_min[...])
        min_sq[...] = jnp.where(better, tile_min, min_sq[...])

    is_last = k == nk - 1
    if (n_true % tn) != 0:
        # interior tiles: unmasked fast path; last tile: mask padded columns
        @pl.when(k < nk - 1)
        def _():
            update(d2)

        @pl.when(is_last)
        def _():
            update(jnp.where(col < n_true, d2, jnp.inf))
    else:
        update(d2)

    @pl.when(is_last)
    def _():
        idx_ref[...] = arg_min[...]
        # sqrt only on the (tm, 1) minima; squared distance >= 0, so no NaN
        dist_ref[...] = jnp.sqrt(min_sq[...]).astype(dist_ref.dtype)


def get_nearest_neighbour(a, b, n_neighbours=1, indices_only=True):
    """a: (2, m) interp points, b: (2, n) grid points.

    Returns (indices (m, 1) int32, distances (m, 1) f32) — same shapes as the
    PyTorch `torch.topk(D, 1, 1, largest=False)` result.
    """
    assert n_neighbours == 1  # TODO(synk): only k=1 supported (module uses 1)
    two, m = a.shape
    _, n = b.shape
    assert two == 2

    m_pad8 = _round_up(m, 8)
    tm = min(256, m_pad8)
    m_pad = _round_up(m, tm)
    tn = min(1024, _round_up(n, 128))
    n_pad = _round_up(n, tn)

    # stations -> (m_pad, 2) sublane-major; grid coords -> (2, n_pad)
    # lane-major (lane-dense, no per-vreg lane broadcast needed in-kernel).
    a_p = jnp.zeros((m_pad, 2), jnp.float32).at[:m, :].set(
        a.astype(jnp.float32).T)
    b_p = jnp.zeros((2, n_pad), jnp.float32).at[:, :n].set(
        b.astype(jnp.float32))

    grid = (m_pad // tm, n_pad // tn)
    kernel = functools.partial(_nearest_kernel, n_true=n, tn=tn)

    idx, dist = pl.pallas_call(
        kernel,
        out_shape=(jax.ShapeDtypeStruct((m_pad, 1), jnp.int32),
                   jax.ShapeDtypeStruct((m_pad, 1), jnp.float32)),
        grid_spec=pltpu.PrefetchScalarGridSpec(
            num_scalar_prefetch=0,
            grid=grid,
            in_specs=[pl.BlockSpec((tm, 2), lambda i, k: (i, 0)),
                      pl.BlockSpec((2, tn), lambda i, k: (0, k))],
            out_specs=(pl.BlockSpec((tm, 1), lambda i, k: (i, 0)),
                       pl.BlockSpec((tm, 1), lambda i, k: (i, 0))),
            scratch_shapes=[pltpu.VMEM((tm, 1), jnp.float32),
                            pltpu.VMEM((tm, 1), jnp.int32)]),
        compiler_params=pltpu.CompilerParams(
            dimension_semantics=("parallel", "arbitrary"),
            vmem_limit_bytes=32 * 1024 * 1024),
    )(a_p, b_p)

    return idx[:m], dist[:m]


# --------------------------------------------------------------------------
# Kernel 2 (forward): scalar-prefetch DMA row gather.
#   Source is values transposed to (n, 1, bc); for grid step j the BlockSpec
#   index_map reads idx[j] from SMEM and DMAs that single (1, 1, bc) row to
#   VMEM; the kernel body is a plain copy.  Exact for every dtype.
# --------------------------------------------------------------------------
def _gather_row_kernel(idx_ref, src_ref, out_ref):
    del idx_ref  # only consumed by the BlockSpec index_maps
    out_ref[...] = src_ref[...]


@jax.jit
def _interp_forward(values, indices):
    """values: (..., n), indices: (m,) int32 -> (..., m, 1)."""
    lead = values.shape[:-1]
    n = values.shape[-1]
    m = indices.shape[0]
    bc = math.prod(lead)

    # one transpose pass (fused under jit); rows of `src` are lane-dense (bc)
    src = values.reshape(bc, n).T.reshape(n, 1, bc)

    gathered = pl.pallas_call(
        _gather_row_kernel,
        out_shape=jax.ShapeDtypeStruct((m, 1, bc), values.dtype),
        grid_spec=pltpu.PrefetchScalarGridSpec(
            num_scalar_prefetch=1,
            grid=(m,),
            in_specs=[pl.BlockSpec((1, 1, bc),
                                   lambda j, idx: (idx[j], 0, 0))],
            out_specs=pl.BlockSpec((1, 1, bc),
                                   lambda j, idx: (j, 0, 0))),
        compiler_params=pltpu.CompilerParams(
            dimension_semantics=("parallel",),
            vmem_limit_bytes=32 * 1024 * 1024),
    )(indices, src)

    # (m, bc) -> (bc, m) -> (..., m, 1)
    return gathered.reshape(m, bc).T.reshape(*lead, m, 1)


# --------------------------------------------------------------------------
# Module-equivalent wrapper
# --------------------------------------------------------------------------
class Interpolator:
    """JAX/Pallas port of the PyTorch Interpolator (mode='nearest')."""

    def __init__(self, interp_points, values_points, mode="nearest"):
        indices, dists = get_nearest_neighbour(interp_points, values_points)
        self.nearest_neighbour = indices                  # (m, 1) int32
        self.nearest_neighbour_values = dists             # (m, 1) float32
        self.wrf_grid = values_points
        self.stations_grid = interp_points
        self._n = values_points.shape[1]
        self._flat_idx = indices.reshape(-1).astype(jnp.int32)   # (m,)

    def calc_bilinear_coefs(self):
        pass  # TODO(synk): not implemented in the reference module either

    def __call__(self, values):
        # values: (..., n) -> (..., m, 1)   (matches values[..., idx_(m,1)])
        assert values.shape[-1] == self._n, (values.shape[-1], self._n)
        return _interp_forward(values, self._flat_idx)


if __name__ == "__main__":
    key = jax.random.PRNGKey(0)
    k1, k2, k3 = jax.random.split(key, 3)

    m, n = 8, 64          # 8 interpolation (station) points, 64 grid points
    B, C = 2, 4           # leading dims of `values`

    interp_points = jax.random.uniform(k1, (2, m), jnp.float32)
    values_points = jax.random.uniform(k2, (2, n), jnp.float32)
    values = jax.random.normal(k3, (B, C, n), jnp.float32)

    interp = Interpolator(interp_points, values_points)
    out = jax.block_until_ready(interp(values))

    # plain-JAX reference (direct squared-distance formulation)
    d2_ref = jnp.sum(
        (interp_points[:, :, None] - values_points[:, None, :]) ** 2, axis=0)
    idx_ref = jnp.argmin(d2_ref, axis=1)                      # (m,)
    ref_out = values[..., idx_ref][..., None]                 # (B, C, m, 1)
    ref_dist = jnp.sqrt(d2_ref[jnp.arange(m), idx_ref])

    assert out.shape == (B, C, m, 1), out.shape
    assert jnp.array_equal(interp.nearest_neighbour[:, 0], idx_ref)
    assert jnp.allclose(interp.nearest_neighbour_values[:, 0], ref_dist,
                        atol=1e-5)
    assert jnp.array_equal(out, ref_out)   # gather is now bit-exact
    print("KERNEL_OK")
</pallas_src>

<mosaic_0001>
module attributes {stable_mosaic.version = 11 : i64} {
  func.func @_nearest_kernel(%arg0: i32, %arg1: i32, %arg2: memref<8x2xf32, #tpu.memory_space<vmem>>, %arg3: memref<2x128xf32, #tpu.memory_space<vmem>>, %arg4: memref<8x1xi32, #tpu.memory_space<vmem>>, %arg5: memref<8x1xf32, #tpu.memory_space<vmem>>, %arg6: memref<8x1xf32, #tpu.memory_space<vmem>>, %arg7: memref<8x1xi32, #tpu.memory_space<vmem>>) attributes {dimension_semantics = [#tpu.dimension_semantics<parallel>, #tpu.dimension_semantics<arbitrary>], iteration_bounds = array<i64: 1, 1>, scalar_prefetch = 0 : i64, scratch_operands = 2 : i64, tpu.core_type = #tpu.core_type<tc>, window_params = [{transform_indices = @transform_0, window_bounds = array<i64: 8, 2>}, {transform_indices = @transform_1, window_bounds = array<i64: 2, 128>}, {transform_indices = @transform_2, window_bounds = array<i64: 8, 1>}, {transform_indices = @transform_3, window_bounds = array<i64: 8, 1>}]} {
    %c0_i32 = arith.constant 0 : i32
    %0 = arith.cmpi eq, %arg1, %c0_i32 : i32
    %1 = arith.extui %0 : i1 to i32
    %c0_i32_0 = arith.constant 0 : i32
    %2 = arith.cmpi ne, %1, %c0_i32_0 : i32
    scf.if %2 {
      %cst = arith.constant 0x7F800000 : f32
      %28 = vector.broadcast %cst : f32 to vector<8x1xf32>
      %c0_12 = arith.constant 0 : index
      %c0_13 = arith.constant 0 : index
      %29 = vector.load %arg6[%c0_12, %c0_13] : memref<8x1xf32, #tpu.memory_space<vmem>>, vector<8x1xf32>
      tpu.vector_store %arg6[%c0_12, %c0_13], %28 {strides = array<i32>} : memref<8x1xf32, #tpu.memory_space<vmem>>, vector<8x1xf32>,
      %c0_i32_14 = arith.constant 0 : i32
      %30 = vector.broadcast %c0_i32_14 : i32 to vector<8x1xi32>
      %c0_15 = arith.constant 0 : index
      %c0_16 = arith.constant 0 : index
      %31 = vector.load %arg7[%c0_15, %c0_16] : memref<8x1xi32, #tpu.memory_space<vmem>>, vector<8x1xi32>
      tpu.vector_store %arg7[%c0_15, %c0_16], %30 {strides = array<i32>} : memref<8x1xi32, #tpu.memory_space<vmem>>, vector<8x1xi32>,
    } else {
    }
    %c0 = arith.constant 0 : index
    %c0_1 = arith.constant 0 : index
    %3 = vector.load %arg2[%c0, %c0_1] : memref<8x2xf32, #tpu.memory_space<vmem>>, vector<8x1xf32>
    %c0_2 = arith.constant 0 : index
    %c1 = arith.constant 1 : index
    %4 = vector.load %arg2[%c0_2, %c1] : memref<8x2xf32, #tpu.memory_space<vmem>>, vector<8x1xf32>
    %c0_3 = arith.constant 0 : index
    %c0_4 = arith.constant 0 : index
    %5 = vector.load %arg3[%c0_3, %c0_4] : memref<2x128xf32, #tpu.memory_space<vmem>>, vector<1x128xf32>
    %c1_5 = arith.constant 1 : index
    %c0_6 = arith.constant 0 : index
    %6 = vector.load %arg3[%c1_5, %c0_6] : memref<2x128xf32, #tpu.memory_space<vmem>>, vector<1x128xf32>
    %7 = vector.broadcast %5 : vector<1x128xf32> to vector<8x128xf32>
    %8 = vector.broadcast %3 : vector<8x1xf32> to vector<8x128xf32>
    %9 = arith.subf %7, %8 : vector<8x128xf32>
    %10 = vector.broadcast %6 : vector<1x128xf32> to vector<8x128xf32>
    %11 = vector.broadcast %4 : vector<8x1xf32> to vector<8x128xf32>
    %12 = arith.subf %10, %11 : vector<8x128xf32>
    %13 = arith.mulf %9, %9 : vector<8x128xf32>
    %14 = arith.mulf %12, %12 : vector<8x128xf32>
    %15 = arith.addf %13, %14 : vector<8x128xf32>
    %16 = tpu.iota {dimensions = array<i32: 1>} : vector<8x128xi32>
    %c128_i32 = arith.constant 128 : i32
    %17 = arith.muli %arg1, %c128_i32 : i32
    %18 = vector.broadcast %17 : i32 to vector<8x128xi32>
    %19 = arith.addi %16, %18 : vector<8x128xi32>
    %c0_i32_7 = arith.constant 0 : i32
    %20 = arith.cmpi eq, %arg1, %c0_i32_7 : i32
    %c0_i32_8 = arith.constant 0 : i32
    %21 = arith.cmpi slt, %arg1, %c0_i32_8 : i32
    %22 = arith.extui %21 : i1 to i32
    %c0_i32_9 = arith.constant 0 : i32
    %23 = arith.cmpi ne, %22, %c0_i32_9 : i32
    scf.if %23 {
      %cst = arith.constant dense<0x7F800000> : vector<8xf32>
      %28 = vector.multi_reduction <minimumf>, %15, %cst [1] : vector<8x128xf32> to vector<8xf32>
      %29 = vector.shape_cast %28 : vector<8xf32> to vector<8x1xf32>
      %30 = vector.broadcast %29 : vector<8x1xf32> to vector<8x128xf32>
      %31 = arith.cmpf oeq, %15, %30 : vector<8x128xf32>
      %c2147483647_i32 = arith.constant 2147483647 : i32
      %32 = vector.broadcast %c2147483647_i32 : i32 to vector<8x128xi32>
      %33 = arith.select %31, %19, %32 : vector<8x128xi1>, vector<8x128xi32>
      %cst_12 = arith.constant dense<2147483647> : vector<8xi32>
      %34 = vector.multi_reduction <minsi>, %33, %cst_12 [1] : vector<8x128xi32> to vector<8xi32>
      %35 = vector.shape_cast %34 : vector<8xi32> to vector<8x1xi32>
      %c0_13 = arith.constant 0 : index
      %c0_14 = arith.constant 0 : index
      %36 = vector.load %arg6[%c0_13, %c0_14] : memref<8x1xf32, #tpu.memory_space<vmem>>, vector<8x1xf32>
      %37 = arith.cmpf olt, %29, %36 : vector<8x1xf32>
      %c0_15 = arith.constant 0 : index
      %c0_16 = arith.constant 0 : index
      %38 = vector.load %arg7[%c0_15, %c0_16] : memref<8x1xi32, #tpu.memory_space<vmem>>, vector<8x1xi32>
      %39 = arith.select %37, %35, %38 : vector<8x1xi1>, vector<8x1xi32>
      %c0_17 = arith.constant 0 : index
      %c0_18 = arith.constant 0 : index
      %40 = vector.load %arg7[%c0_17, %c0_18] : memref<8x1xi32, #tpu.memory_space<vmem>>, vector<8x1xi32>
      tpu.vector_store %arg7[%c0_17, %c0_18], %39 {strides = array<i32>} : memref<8x1xi32, #tpu.memory_space<vmem>>, vector<8x1xi32>,
      %c0_19 = arith.constant 0 : index
      %c0_20 = arith.constant 0 : index
      %41 = vector.load %arg6[%c0_19, %c0_20] : memref<8x1xf32, #tpu.memory_space<vmem>>, vector<8x1xf32>
      %42 = arith.select %37, %29, %41 : vector<8x1xi1>, vector<8x1xf32>
      %c0_21 = arith.constant 0 : index
      %c0_22 = arith.constant 0 : index
      %43 = vector.load %arg6[%c0_21, %c0_22] : memref<8x1xf32, #tpu.memory_space<vmem>>, vector<8x1xf32>
      tpu.vector_store %arg6[%c0_21, %c0_22], %42 {strides = array<i32>} : memref<8x1xf32, #tpu.memory_space<vmem>>, vector<8x1xf32>,
    } else {
    }
    %24 = arith.extui %20 : i1 to i32
    %c0_i32_10 = arith.constant 0 : i32
    %25 = arith.cmpi ne, %24, %c0_i32_10 : i32
    scf.if %25 {
      %c64_i32 = arith.constant 64 : i32
      %28 = vector.broadcast %c64_i32 : i32 to vector<8x128xi32>
      %29 = arith.cmpi slt, %19, %28 : vector<8x128xi32>
      %cst = arith.constant 0x7F800000 : f32
      %30 = vector.broadcast %cst : f32 to vector<8x128xf32>
      %31 = arith.select %29, %15, %30 : vector<8x128xi1>, vector<8x128xf32>
      %cst_12 = arith.constant dense<0x7F800000> : vector<8xf32>
      %32 = vector.multi_reduction <minimumf>, %31, %cst_12 [1] : vector<8x128xf32> to vector<8xf32>
      %33 = vector.shape_cast %32 : vector<8xf32> to vector<8x1xf32>
      %34 = vector.broadcast %33 : vector<8x1xf32> to vector<8x128xf32>
      %35 = arith.cmpf oeq, %31, %34 : vector<8x128xf32>
      %c2147483647_i32 = arith.constant 2147483647 : i32
      %36 = vector.broadcast %c2147483647_i32 : i32 to vector<8x128xi32>
      %37 = arith.select %35, %19, %36 : vector<8x128xi1>, vector<8x128xi32>
      %cst_13 = arith.constant dense<2147483647> : vector<8xi32>
      %38 = vector.multi_reduction <minsi>, %37, %cst_13 [1] : vector<8x128xi32> to vector<8xi32>
      %39 = vector.shape_cast %38 : vector<8xi32> to vector<8x1xi32>
      %c0_14 = arith.constant 0 : index
      %c0_15 = arith.constant 0 : index
      %40 = vector.load %arg6[%c0_14, %c0_15] : memref<8x1xf32, #tpu.memory_space<vmem>>, vector<8x1xf32>
      %41 = arith.cmpf olt, %33, %40 : vector<8x1xf32>
      %c0_16 = arith.constant 0 : index
      %c0_17 = arith.constant 0 : index
      %42 = vector.load %arg7[%c0_16, %c0_17] : memref<8x1xi32, #tpu.memory_space<vmem>>, vector<8x1xi32>
      %43 = arith.select %41, %39, %42 : vector<8x1xi1>, vector<8x1xi32>
      %c0_18 = arith.constant 0 : index
      %c0_19 = arith.constant 0 : index
      %44 = vector.load %arg7[%c0_18, %c0_19] : memref<8x1xi32, #tpu.memory_space<vmem>>, vector<8x1xi32>
      tpu.vector_store %arg7[%c0_18, %c0_19], %43 {strides = array<i32>} : memref<8x1xi32, #tpu.memory_space<vmem>>, vector<8x1xi32>,
      %c0_20 = arith.constant 0 : index
      %c0_21 = arith.constant 0 : index
      %45 = vector.load %arg6[%c0_20, %c0_21] : memref<8x1xf32, #tpu.memory_space<vmem>>, vector<8x1xf32>
      %46 = arith.select %41, %33, %45 : vector<8x1xi1>, vector<8x1xf32>
      %c0_22 = arith.constant 0 : index
      %c0_23 = arith.constant 0 : index
      %47 = vector.load %arg6[%c0_22, %c0_23] : memref<8x1xf32, #tpu.memory_space<vmem>>, vector<8x1xf32>
      tpu.vector_store %arg6[%c0_22, %c0_23], %46 {strides = array<i32>} : memref<8x1xf32, #tpu.memory_space<vmem>>, vector<8x1xf32>,
    } else {
    }
    %26 = arith.extui %20 : i1 to i32
    %c0_i32_11 = arith.constant 0 : i32
    %27 = arith.cmpi ne, %26, %c0_i32_11 : i32
    scf.if %27 {
      %c0_12 = arith.constant 0 : index
      %c0_13 = arith.constant 0 : index
      %28 = vector.load %arg7[%c0_12, %c0_13] : memref<8x1xi32, #tpu.memory_space<vmem>>, vector<8x1xi32>
      %c0_14 = arith.constant 0 : index
      %c0_15 = arith.constant 0 : index
      %29 = vector.load %arg4[%c0_14, %c0_15] : memref<8x1xi32, #tpu.memory_space<vmem>>, vector<8x1xi32>
      tpu.vector_store %arg4[%c0_14, %c0_15], %28 {strides = array<i32>} : memref<8x1xi32, #tpu.memory_space<vmem>>, vector<8x1xi32>,
      %c0_16 = arith.constant 0 : index
      %c0_17 = arith.constant 0 : index
      %30 = vector.load %arg6[%c0_16, %c0_17] : memref<8x1xf32, #tpu.memory_space<vmem>>, vector<8x1xf32>
      %31 = math.sqrt %30 : vector<8x1xf32>
      %c0_18 = arith.constant 0 : index
      %c0_19 = arith.constant 0 : index
      %32 = vector.load %arg5[%c0_18, %c0_19] : memref<8x1xf32, #tpu.memory_space<vmem>>, vector<8x1xf32>
      tpu.vector_store %arg5[%c0_18, %c0_19], %31 {strides = array<i32>} : memref<8x1xf32, #tpu.memory_space<vmem>>, vector<8x1xf32>,
    } else {
    }
    return
  }
  func.func @transform_0(%arg0: i32, %arg1: i32) -> (i32, i32) {
    %c0_i32 = arith.constant 0 : i32
    %c0_i32_0 = arith.constant 0 : i32
    return %arg0, %c0_i32 : i32, i32
  }
  func.func @transform_1(%arg0: i32, %arg1: i32) -> (i32, i32) {
    %c0_i32 = arith.constant 0 : i32
    %c0_i32_0 = arith.constant 0 : i32
    return %c0_i32, %arg1 : i32, i32
  }
  func.func @transform_2(%arg0: i32, %arg1: i32) -> (i32, i32) {
    %c0_i32 = arith.constant 0 : i32
    %c0_i32_0 = arith.constant 0 : i32
    return %arg0, %c0_i32 : i32, i32
  }
  func.func @transform_3(%arg0: i32, %arg1: i32) -> (i32, i32) {
    %c0_i32 = arith.constant 0 : i32
    %c0_i32_0 = arith.constant 0 : i32
    return %arg0, %c0_i32 : i32, i32
  }
}

</mosaic_0001>

<bundles_post_ra>
// kernel: tpu_custom_call.1
= control target key start
LH: loop header
LB: loop body
LE: loop exit
PB: predicated region body
PF: predicated region fallthrough
CT: control target
= control target key end

     0   :  { %vm17_vm0 = vcmask 7168   ;;  %v140_v0 = vmov 0   ;;  %v141_v2 = vmov 1   ;;  %v142_v3 = vmov inf   ;;  %s186_s0 = inlined_call_operand.vmem [shape: f32[8,2], index: 0, kind: input, shape index: {}]   ;;  %s187_s1 = inlined_call_operand.vmem [shape: f32[2,128], index: 1, kind: input, shape index: {}]   ;;  %s188_s3 = inlined_call_operand.vmem [shape: f32[8,1], index: 3, kind: output, shape index: {1}]   ;;  %s189_s2 = inlined_call_operand.vmem [shape: s32[8,1], index: 2, kind: output, shape index: {0}]  }
   0x1   :  { %134 = vset.pattern.permute.xlu0 %v140_v0  ;;  %19 = vst.msk [vmem:[#allocation3] sm:$0xff] %vm17_vm0, %v140_v0  ;;  %v20_v1 = vld [vmem:[%s186_s0] sm:$0xff]  ;;  %v39_v6 = vlaneseq }
   0x2   :  { %26 = vperm.xlu0 %134, %v20_v1   ;;  %18 = vst.msk [vmem:[#allocation2] sm:$0xff] %vm17_vm0, %v142_v3  ;;  %v136_v5 = vld [vmem:[%s187_s1] ss:$0 sm:$0xff]  ;;  %v137_v7 = vld [vmem:[%s187_s1 + $0x1] ss:$0 sm:$0xff] }
   0x3   :  { %v40_v10 = vand.u32 127, %v39_v6 }
   0x5   :  { %vm78_vm1 = vcmp.lt.s32.totalorder %v40_v10, 64 }
   0x8   :  { %v100_v41 = vld [vmem:[#allocation3] sm:$0xff] }
   0x9   :  { %v98_v16 = vld [vmem:[#allocation2] sm:$0xff] }
   0xa   :  { %135 = vset.pattern.permute.xlu0 %v141_v2 }
   0xb   :  { %32 = vperm.xlu0 %135, %v20_v1  }
  0x74   :  { %v27_v4 = vpop.permute.xlu0 %26 }
  0x75   :  { %v29_v8 = vsub.f32 %v136_v5, %v27_v4 }
  0x77   :  { %v36_v12 = vmul.f32 %v29_v8, %v29_v8 }
  0x7d   :  { %v33_v9 = vpop.permute.xlu0 %32 }
  0x7e   :  { %v35_v11 = vsub.f32 %v137_v7, %v33_v9 }
  0x80   :  { %v37_v13 = vmul.f32 %v35_v11, %v35_v11 }
  0x82   :  { %v38_v14 = vadd.f32 %v37_v13, %v36_v12 }
  0x84   :  { %v79_v15 = vsel %vm78_vm1, %v38_v14, inf }
  0x85   :  { %80 = vmin.xlane.f32.xlu1 %v79_v15 }
  0xf8   :  { %v81_v17 = vpop.xlane.xlu1 %80 }
  0xf9   :  { %vm82_vm2 = vcmp.eq.f32.partialorder %v79_v15, %v81_v17  ;;  %vm99_vm3 = vcmp.lt.f32.partialorder %v81_v17, %v98_v16 }
  0xfa   :  { %v105_v18 = vsel %vm99_vm3, %v81_v17, %v98_v16  ;;  %v83_v19 = vsel %vm82_vm2, %v40_v10, 2147483647 }
  0xfb   :  { %106 = vst.msk [vmem:[#allocation2] sm:$0xff] %vm17_vm0, %v105_v18  ;;  %v85_v20 = vshra.s32 %v83_v19, 16  ;;  %v84_v33 = vand.u32 65535, %v83_v19 }
  0xfd   :  { %v87_v21 = vcvt.s32.f32 %v85_v20  ;;  %v86_v35 = vcvt.s32.f32 %v84_v33 }
  0xff   :  { %88 = vmin.xlane.f32.xlu1 %v87_v21 }
 0x102   :  { %v109_v22 = vld [vmem:[#allocation2] sm:$0xff] }
 0x103   :  { %138 = vrsqrt.f32 %v109_v22  ;;  %vm117_vm4 = vcmp.eq.f32.partialorder %v109_v22, inf  ;;  %v120_v30 = vand.u32 2147483648, %v109_v22  ;;  %vm119_vm5 = vcmp.eq.f32.partialorder %v109_v22, 0.0 }
 0x109   :  { %v139_v23 = vpop.eup %138 }
 0x10a   :  { %v111_v24 = vmul.f32 %v139_v23, %v109_v22 }
 0x10c   :  { %v112_v25 = vmul.f32 %v139_v23, %v111_v24 }
 0x10e   :  { %v113_v26 = vmul.f32 0.5, %v112_v25 }
 0x110   :  { %v114_v27 = vsub.f32 1.5, %v113_v26 }
 0x112   :  { %v115_v28 = vmul.f32 %v139_v23, %v114_v27 }
 0x114   :  { %v116_v29 = vmul.f32 %v115_v28, %v109_v22 }
 0x116   :  { %v118_v31 = vsel %vm117_vm4, %v109_v22, %v116_v29 }
 0x117   :  { %v121_v32 = vsel %vm119_vm5, %v120_v30, %v118_v31 }
 0x118   :  { %122 = vst.msk [vmem:[%s188_s3] sm:$0xff] %vm17_vm0, %v121_v32 }
 0x172   :  { %v89_v34 = vpop.xlane.xlu1 %88 }
 0x173   :  { %vm90_vm6 = vcmp.eq.f32.partialorder %v87_v21, %v89_v34  ;;  %v95_v37 = vcvt.f32.s32 %v89_v34 }
 0x174   :  { %v91_v36 = vsel %vm90_vm6, %v86_v35, inf }
 0x175   :  { %92 = vmin.xlane.f32.xlu2 %v91_v36  ;;  %v96_v39 = vshll.u32 %v95_v37, 16 }
 0x1e8   :  { %v93_v38 = vpop.xlane.xlu2 %92 }
 0x1e9   :  { %v94_v40 = vcvt.f32.s32 %v93_v38 }
 0x1eb   :  { %v97_v42 = vadd.s32 %v96_v39, %v94_v40 }
 0x1ed   :  { %v101_v43 = vsel %vm99_vm3, %v97_v42, %v100_v41 }
 0x1ee   :  { %103 = vst.msk [vmem:[#allocation3] sm:$0xff] %vm17_vm0, %v101_v43 }
 0x1f5   :  { %v107_v44 = vld [vmem:[#allocation3] sm:$0xff] }
 0x1f6   :  { %108 = vst.msk [vmem:[%s189_s2] sm:$0xff] %vm17_vm0, %v107_v44 }

</bundles_post_ra>
